<compile_context>
chip_gen: v7x
topology: tpu7x:2x2x1
jax: 0.10.0
libtpu: 0.0.40
codegen_flags: <defaults>
</compile_context>

<pallas_src>
import functools
import math

import jax
import jax.numpy as jnp
import numpy as np
from jax.experimental import pallas as pl
from jax.experimental.pallas import tpu as pltpu


def _round_up(x, m):
    return (x + m - 1) // m * m


def _vmem_cap_bytes():
    """Physical VMEM capacity of the local TPU (fallback: v7x's 64 MiB)."""
    try:
        return int(pltpu.get_tpu_info().vmem_capacity_bytes)
    except Exception:
        return 64 * 1024 * 1024


def embeddings_kernel(ids_ref, table_ref, gamma_ref, beta_ref, o_ref, *, d_out):
    """One row tile: per-token gather of 3 folded rows (word/syllable/segment) from the
    fused VMEM-resident table, summed in f32, then vectorized LayerNorm."""
    tile_n = o_ref.shape[0]
    base = pl.program_id(0) * tile_n

    def gather_one(r, carry):
        tok = base + r
        w = ids_ref[0, tok]            # SMEM scalar reads (ids pre-offset, disjoint ranges)
        s = ids_ref[1, tok]
        g = ids_ref[2, tok]
        row = (table_ref[pl.ds(w, 1), :]
               + table_ref[pl.ds(s, 1), :]
               + table_ref[pl.ds(g, 1), :])          # (1, d_pad) f32
        o_ref[pl.ds(r, 1), :] = row.astype(o_ref.dtype)
        return carry

    jax.lax.fori_loop(0, tile_n, gather_one, 0, unroll=8)

    # Vectorized LayerNorm over the tile.  Padded lanes of `emb` are exactly 0 (zero
    # table columns), so sums over d_pad equal sums over d_out -- no lane mask needed.
    emb = o_ref[...].astype(jnp.float32)             # (tile_n, d_pad)
    inv_d = jnp.float32(1.0 / d_out)
    mean = jnp.sum(emb, axis=-1, keepdims=True) * inv_d
    var = jnp.sum(emb * emb, axis=-1, keepdims=True) * inv_d - mean * mean
    var = jnp.maximum(var, 0.0)                      # guard f32 cancellation
    normed = (emb - mean) * jax.lax.rsqrt(var + jnp.float32(1e-5))   # eps: PyTorch default
    # dropout: eval-mode identity.  gamma/beta zero-padded -> padded output lanes stay 0.
    o_ref[...] = (normed * gamma_ref[...] + beta_ref[...]).astype(o_ref.dtype)


def embeddings_forward(word_ids, segment_ids, params, *, max_tile_n=512):
    """word_ids, segment_ids: (seq, batch) int. Returns (seq, batch, D_out) float32."""
    table = params["fused_table"]          # (k_pad, d_pad) f32, projections folded in
    gamma = params["gamma_pad"]            # (1, d_pad) f32
    beta = params["beta_pad"]              # (1, d_pad) f32
    d_out = params["d_out"]
    vocab = params["vocab_size"]
    num_syl = params["num_syl_classes"]
    k_pad, d_pad = table.shape

    wid = word_ids.reshape(-1).astype(jnp.int32)
    sid = params["word2syllable"][wid].astype(jnp.int32) + vocab          # syllable rows
    gid = segment_ids.reshape(-1).astype(jnp.int32) + vocab + num_syl     # segment rows
    n = wid.shape[0]

    # Row tiling: big tiles to amortize per-step overhead, but keep >= 2 grid steps
    # when possible so v7x's two TensorCores both get work.
    max_tile_n = max(8, (min(max_tile_n, 1024) // 8) * 8)
    n_tiles = max(2, -(-n // max_tile_n))
    tile_n = max(8, _round_up(-(-n // n_tiles), 8))
    n_pad = _round_up(n, tile_n)

    ids = jnp.stack([wid, sid, gid], axis=0)                              # (3, n) int32
    if n_pad != n:
        ids = jnp.pad(ids, ((0, 0), (0, n_pad - n)))   # pad rows gather row 0 (harmless, sliced)
    # TODO(synk): ids live in SMEM via scalar prefetch; for very long sequences (>~32k
    # tokens) switch to blocked SMEM id tiles to respect the SMEM budget.

    # VMEM budget: single table copy + gamma/beta + double-buffered f32 output tile.
    needed = (table.size * table.dtype.itemsize
              + (gamma.size + beta.size) * 4
              + 2 * tile_n * d_pad * 4)
    vmem_limit = max(needed + (4 << 20), 16 << 20)
    vmem_limit = min(vmem_limit, _vmem_cap_bytes() * 7 // 8)

    out = pl.pallas_call(
        functools.partial(embeddings_kernel, d_out=d_out),
        out_shape=jax.ShapeDtypeStruct((n_pad, d_pad), jnp.float32),
        grid_spec=pltpu.PrefetchScalarGridSpec(
            num_scalar_prefetch=1,                     # ids -> SMEM
            grid=(n_pad // tile_n,),
            in_specs=[
                # Whole-array VMEM residents: single-buffered, no per-step re-DMA.
                pl.BlockSpec(memory_space=pltpu.MemorySpace.VMEM),   # fused table
                pl.BlockSpec(memory_space=pltpu.MemorySpace.VMEM),   # gamma
                pl.BlockSpec(memory_space=pltpu.MemorySpace.VMEM),   # beta
            ],
            out_specs=pl.BlockSpec((tile_n, d_pad), lambda i, ids_sm: (i, 0)),
        ),
        compiler_params=pltpu.CompilerParams(
            dimension_semantics=("parallel",),   # 2-TC row split on v7x; harmless elsewhere
            vmem_limit_bytes=int(vmem_limit),
        ),
    )(ids, table, gamma, beta)

    if n_pad != n or d_pad != d_out:
        out = out[:n, :d_out]
    return out.reshape(*word_ids.shape, d_out)


def xavier_uniform_fan_in(key, shape):
    # xavier_uniform_fan_in_: bound = sqrt(3 / fan_in); weight shape (out, in)
    bound = math.sqrt(3.0 / shape[1])
    return jax.random.uniform(key, shape, jnp.float32, -bound, bound)


def build_params(key, *, vocab_size, d_word, d_syl, d_seg, d_out,
                 num_segments, pad_token, max_syll):
    ks = jax.random.split(key, 7)
    hi = jax.lax.Precision.HIGHEST
    # word2syllable buffer (values >= 1); num_classes = max(word2syllable) + 1
    word2syllable = jax.random.randint(ks[0], (vocab_size,), 1, max_syll + 1)
    num_syl_classes = int(word2syllable.max()) + 1     # build-time only (never under jit)

    # WordEmbedding: 'uniform1' (U[-0.1, 0.1]), PAD row zeroed
    e_word = jax.random.uniform(ks[1], (vocab_size, d_word), jnp.float32, -0.1, 0.1)
    e_word = e_word.at[pad_token].set(0.0)
    # SyllableEmbedding: 'normal1' (std 0.02)
    e_syl = 0.02 * jax.random.normal(ks[2], (num_syl_classes, d_syl), jnp.float32)
    # MultiSegmentEmbedding: 'uniform1'
    e_seg = jax.random.uniform(ks[3], (num_segments, d_seg), jnp.float32, -0.1, 0.1)

    # out_proj Linear (no bias) weights (exist because embedding_dim != output_dim)
    w_word = xavier_uniform_fan_in(ks[4], (d_out, d_word))
    w_syl = xavier_uniform_fan_in(ks[5], (d_out, d_syl))
    w_seg = xavier_uniform_fan_in(ks[6], (d_out, d_seg))

    # Fold projections into the tables and fuse them along rows
    # (word rows 0..V-1, then syllable rows, then segment rows).
    f_word = jnp.dot(e_word, w_word.T, precision=hi)   # (vocab, d_out); PAD row stays 0
    f_syl = jnp.dot(e_syl, w_syl.T, precision=hi)      # (num_syl, d_out)
    f_seg = jnp.dot(e_seg, w_seg.T, precision=hi)      # (num_seg, d_out)
    fused = jnp.concatenate([f_word, f_syl, f_seg], axis=0)
    k = fused.shape[0]
    k_pad = _round_up(k, 8)
    d_pad = _round_up(d_out, 128)
    # f32 rows so dynamic (unaligned) sublane row gathers stay on the clean 32-bit path.
    fused = jnp.pad(fused, ((0, k_pad - k), (0, d_pad - d_out))).astype(jnp.float32)

    gamma = jnp.ones((d_out,), jnp.float32)
    beta = jnp.zeros((d_out,), jnp.float32)
    gamma_pad = jnp.pad(gamma, (0, d_pad - d_out)).reshape(1, d_pad)
    beta_pad = jnp.pad(beta, (0, d_pad - d_out)).reshape(1, d_pad)

    return {
        "word2syllable": word2syllable,
        "fused_table": fused,
        "gamma_pad": gamma_pad, "beta_pad": beta_pad,
        "d_out": d_out, "vocab_size": vocab_size, "num_syl_classes": num_syl_classes,
        # unfused f32 params kept only for the pure-JAX reference check below
        "E_word": e_word, "E_syl": e_syl, "E_seg": e_seg,
        "W_word": w_word, "W_syl": w_syl, "W_seg": w_seg,
        "gamma": gamma, "beta": beta,
    }


def embeddings_reference(word_ids, segment_ids, params):
    """Pure-JAX mirror of the PyTorch forward (f32, unfused) for a tolerance check."""
    hi = jax.lax.Precision.HIGHEST
    wid = word_ids.reshape(-1)
    sid = params["word2syllable"][wid]
    gid = segment_ids.reshape(-1)
    ew = jnp.dot(params["E_word"][wid], params["W_word"].T, precision=hi)
    es = jnp.dot(params["E_syl"][sid], params["W_syl"].T, precision=hi)
    eg = jnp.dot(params["E_seg"][gid], params["W_seg"].T, precision=hi)
    emb = ew + es + eg
    mean = emb.mean(-1, keepdims=True)
    var = ((emb - mean) ** 2).mean(-1, keepdims=True)
    out = (emb - mean) * jax.lax.rsqrt(var + 1e-5) * params["gamma"] + params["beta"]
    return out.reshape(*word_ids.shape, -1)


if __name__ == "__main__":
    key = jax.random.PRNGKey(0)
    k_param, k_wid, k_seg = jax.random.split(key, 3)

    SEQ, BATCH = 8, 2
    VOCAB = 32
    D_OUT = 128                    # output_dim multiple of 128 -> lane-dense, no slice
    D_WORD, D_SYL, D_SEG = 64, 48, 16
    NUM_SEGMENTS = 4
    PAD_TOKEN = 0

    params = build_params(k_param, vocab_size=VOCAB, d_word=D_WORD, d_syl=D_SYL,
                          d_seg=D_SEG, d_out=D_OUT, num_segments=NUM_SEGMENTS,
                          pad_token=PAD_TOKEN, max_syll=6)

    word_ids = jax.random.randint(k_wid, (SEQ, BATCH), 0, VOCAB)
    # explicit segment ids (< num_segments), as in forward(..., segment_ids=...)
    segment_ids = jax.random.randint(k_seg, (SEQ, BATCH), 0, NUM_SEGMENTS)

    out = jax.block_until_ready(embeddings_forward(word_ids, segment_ids, params))
    assert out.shape == (SEQ, BATCH, D_OUT) and out.dtype == jnp.float32

    # correctness vs f32 unfused reference
    ref = jax.block_until_ready(embeddings_reference(word_ids, segment_ids, params))
    np.testing.assert_allclose(np.asarray(out), np.asarray(ref), atol=1e-2, rtol=1e-2)

    print("KERNEL_OK")
</pallas_src>

<mosaic_0001>
module attributes {stable_mosaic.version = 11 : i64} {
  func.func @embeddings_kernel(%arg0: i32, %arg1: memref<3x16xi32, #tpu.memory_space<smem>>, %arg2: memref<48x128xf32, #tpu.memory_space<vmem>>, %arg3: memref<1x128xf32, #tpu.memory_space<vmem>>, %arg4: memref<1x128xf32, #tpu.memory_space<vmem>>, %arg5: memref<8x128xf32, #tpu.memory_space<vmem>>) attributes {dimension_semantics = [#tpu.dimension_semantics<parallel>], iteration_bounds = array<i64: 2>, scalar_prefetch = 1 : i64, scratch_operands = 0 : i64, tpu.core_type = #tpu.core_type<tc>, window_params = [{pipeline_mode = #tpu.pipeline_mode<synchronous>, transform_indices = @transform_0, window_bounds = array<i64: 48, 128>}, {pipeline_mode = #tpu.pipeline_mode<synchronous>, transform_indices = @transform_1, window_bounds = array<i64: 1, 128>}, {pipeline_mode = #tpu.pipeline_mode<synchronous>, transform_indices = @transform_2, window_bounds = array<i64: 1, 128>}, {transform_indices = @transform_3, window_bounds = array<i64: 8, 128>}]} {
    %c8_i32 = arith.constant 8 : i32
    %0 = arith.muli %arg0, %c8_i32 : i32
    %c0_i32 = arith.constant 0 : i32
    %1 = arith.addi %0, %c0_i32 : i32
    %c0 = arith.constant 0 : index
    %2 = arith.index_cast %1 : i32 to index
    %3 = memref.load %arg1[%c0, %2] : memref<3x16xi32, #tpu.memory_space<smem>>
    %c1 = arith.constant 1 : index
    %4 = arith.index_cast %1 : i32 to index
    %5 = memref.load %arg1[%c1, %4] : memref<3x16xi32, #tpu.memory_space<smem>>
    %c2 = arith.constant 2 : index
    %6 = arith.index_cast %1 : i32 to index
    %7 = memref.load %arg1[%c2, %6] : memref<3x16xi32, #tpu.memory_space<smem>>
    %8 = arith.index_cast %3 : i32 to index
    %c0_0 = arith.constant 0 : index
    %9 = vector.load %arg2[%8, %c0_0] : memref<48x128xf32, #tpu.memory_space<vmem>>, vector<1x128xf32>
    %10 = arith.index_cast %5 : i32 to index
    %c0_1 = arith.constant 0 : index
    %11 = vector.load %arg2[%10, %c0_1] : memref<48x128xf32, #tpu.memory_space<vmem>>, vector<1x128xf32>
    %12 = arith.addf %9, %11 : vector<1x128xf32>
    %13 = arith.index_cast %7 : i32 to index
    %c0_2 = arith.constant 0 : index
    %14 = vector.load %arg2[%13, %c0_2] : memref<48x128xf32, #tpu.memory_space<vmem>>, vector<1x128xf32>
    %15 = arith.addf %12, %14 : vector<1x128xf32>
    %16 = arith.index_cast %c0_i32 : i32 to index
    %c0_3 = arith.constant 0 : index
    %17 = vector.load %arg5[%16, %c0_3] : memref<8x128xf32, #tpu.memory_space<vmem>>, vector<1x128xf32>
    tpu.vector_store %arg5[%16, %c0_3], %15 {strides = array<i32>} : memref<8x128xf32, #tpu.memory_space<vmem>>, vector<1x128xf32>,
    %c1_i32 = arith.constant 1 : i32
    %18 = arith.addi %0, %c1_i32 : i32
    %c0_4 = arith.constant 0 : index
    %19 = arith.index_cast %18 : i32 to index
    %20 = memref.load %arg1[%c0_4, %19] : memref<3x16xi32, #tpu.memory_space<smem>>
    %c1_5 = arith.constant 1 : index
    %21 = arith.index_cast %18 : i32 to index
    %22 = memref.load %arg1[%c1_5, %21] : memref<3x16xi32, #tpu.memory_space<smem>>
    %c2_6 = arith.constant 2 : index
    %23 = arith.index_cast %18 : i32 to index
    %24 = memref.load %arg1[%c2_6, %23] : memref<3x16xi32, #tpu.memory_space<smem>>
    %25 = arith.index_cast %20 : i32 to index
    %c0_7 = arith.constant 0 : index
    %26 = vector.load %arg2[%25, %c0_7] : memref<48x128xf32, #tpu.memory_space<vmem>>, vector<1x128xf32>
    %27 = arith.index_cast %22 : i32 to index
    %c0_8 = arith.constant 0 : index
    %28 = vector.load %arg2[%27, %c0_8] : memref<48x128xf32, #tpu.memory_space<vmem>>, vector<1x128xf32>
    %29 = arith.addf %26, %28 : vector<1x128xf32>
    %30 = arith.index_cast %24 : i32 to index
    %c0_9 = arith.constant 0 : index
    %31 = vector.load %arg2[%30, %c0_9] : memref<48x128xf32, #tpu.memory_space<vmem>>, vector<1x128xf32>
    %32 = arith.addf %29, %31 : vector<1x128xf32>
    %33 = arith.index_cast %c1_i32 : i32 to index
    %c0_10 = arith.constant 0 : index
    %34 = vector.load %arg5[%33, %c0_10] : memref<8x128xf32, #tpu.memory_space<vmem>>, vector<1x128xf32>
    tpu.vector_store %arg5[%33, %c0_10], %32 {strides = array<i32>} : memref<8x128xf32, #tpu.memory_space<vmem>>, vector<1x128xf32>,
    %c2_i32 = arith.constant 2 : i32
    %35 = arith.addi %0, %c2_i32 : i32
    %c0_11 = arith.constant 0 : index
    %36 = arith.index_cast %35 : i32 to index
    %37 = memref.load %arg1[%c0_11, %36] : memref<3x16xi32, #tpu.memory_space<smem>>
    %c1_12 = arith.constant 1 : index
    %38 = arith.index_cast %35 : i32 to index
    %39 = memref.load %arg1[%c1_12, %38] : memref<3x16xi32, #tpu.memory_space<smem>>
    %c2_13 = arith.constant 2 : index
    %40 = arith.index_cast %35 : i32 to index
    %41 = memref.load %arg1[%c2_13, %40] : memref<3x16xi32, #tpu.memory_space<smem>>
    %42 = arith.index_cast %37 : i32 to index
    %c0_14 = arith.constant 0 : index
    %43 = vector.load %arg2[%42, %c0_14] : memref<48x128xf32, #tpu.memory_space<vmem>>, vector<1x128xf32>
    %44 = arith.index_cast %39 : i32 to index
    %c0_15 = arith.constant 0 : index
    %45 = vector.load %arg2[%44, %c0_15] : memref<48x128xf32, #tpu.memory_space<vmem>>, vector<1x128xf32>
    %46 = arith.addf %43, %45 : vector<1x128xf32>
    %47 = arith.index_cast %41 : i32 to index
    %c0_16 = arith.constant 0 : index
    %48 = vector.load %arg2[%47, %c0_16] : memref<48x128xf32, #tpu.memory_space<vmem>>, vector<1x128xf32>
    %49 = arith.addf %46, %48 : vector<1x128xf32>
    %50 = arith.index_cast %c2_i32 : i32 to index
    %c0_17 = arith.constant 0 : index
    %51 = vector.load %arg5[%50, %c0_17] : memref<8x128xf32, #tpu.memory_space<vmem>>, vector<1x128xf32>
    tpu.vector_store %arg5[%50, %c0_17], %49 {strides = array<i32>} : memref<8x128xf32, #tpu.memory_space<vmem>>, vector<1x128xf32>,
    %c3_i32 = arith.constant 3 : i32
    %52 = arith.addi %0, %c3_i32 : i32
    %c0_18 = arith.constant 0 : index
    %53 = arith.index_cast %52 : i32 to index
    %54 = memref.load %arg1[%c0_18, %53] : memref<3x16xi32, #tpu.memory_space<smem>>
    %c1_19 = arith.constant 1 : index
    %55 = arith.index_cast %52 : i32 to index
    %56 = memref.load %arg1[%c1_19, %55] : memref<3x16xi32, #tpu.memory_space<smem>>
    %c2_20 = arith.constant 2 : index
    %57 = arith.index_cast %52 : i32 to index
    %58 = memref.load %arg1[%c2_20, %57] : memref<3x16xi32, #tpu.memory_space<smem>>
    %59 = arith.index_cast %54 : i32 to index
    %c0_21 = arith.constant 0 : index
    %60 = vector.load %arg2[%59, %c0_21] : memref<48x128xf32, #tpu.memory_space<vmem>>, vector<1x128xf32>
    %61 = arith.index_cast %56 : i32 to index
    %c0_22 = arith.constant 0 : index
    %62 = vector.load %arg2[%61, %c0_22] : memref<48x128xf32, #tpu.memory_space<vmem>>, vector<1x128xf32>
    %63 = arith.addf %60, %62 : vector<1x128xf32>
    %64 = arith.index_cast %58 : i32 to index
    %c0_23 = arith.constant 0 : index
    %65 = vector.load %arg2[%64, %c0_23] : memref<48x128xf32, #tpu.memory_space<vmem>>, vector<1x128xf32>
    %66 = arith.addf %63, %65 : vector<1x128xf32>
    %67 = arith.index_cast %c3_i32 : i32 to index
    %c0_24 = arith.constant 0 : index
    %68 = vector.load %arg5[%67, %c0_24] : memref<8x128xf32, #tpu.memory_space<vmem>>, vector<1x128xf32>
    tpu.vector_store %arg5[%67, %c0_24], %66 {strides = array<i32>} : memref<8x128xf32, #tpu.memory_space<vmem>>, vector<1x128xf32>,
    %c4_i32 = arith.constant 4 : i32
    %69 = arith.addi %0, %c4_i32 : i32
    %c0_25 = arith.constant 0 : index
    %70 = arith.index_cast %69 : i32 to index
    %71 = memref.load %arg1[%c0_25, %70] : memref<3x16xi32, #tpu.memory_space<smem>>
    %c1_26 = arith.constant 1 : index
    %72 = arith.index_cast %69 : i32 to index
    %73 = memref.load %arg1[%c1_26, %72] : memref<3x16xi32, #tpu.memory_space<smem>>
    %c2_27 = arith.constant 2 : index
    %74 = arith.index_cast %69 : i32 to index
    %75 = memref.load %arg1[%c2_27, %74] : memref<3x16xi32, #tpu.memory_space<smem>>
    %76 = arith.index_cast %71 : i32 to index
    %c0_28 = arith.constant 0 : index
    %77 = vector.load %arg2[%76, %c0_28] : memref<48x128xf32, #tpu.memory_space<vmem>>, vector<1x128xf32>
    %78 = arith.index_cast %73 : i32 to index
    %c0_29 = arith.constant 0 : index
    %79 = vector.load %arg2[%78, %c0_29] : memref<48x128xf32, #tpu.memory_space<vmem>>, vector<1x128xf32>
    %80 = arith.addf %77, %79 : vector<1x128xf32>
    %81 = arith.index_cast %75 : i32 to index
    %c0_30 = arith.constant 0 : index
    %82 = vector.load %arg2[%81, %c0_30] : memref<48x128xf32, #tpu.memory_space<vmem>>, vector<1x128xf32>
    %83 = arith.addf %80, %82 : vector<1x128xf32>
    %84 = arith.index_cast %c4_i32 : i32 to index
    %c0_31 = arith.constant 0 : index
    %85 = vector.load %arg5[%84, %c0_31] : memref<8x128xf32, #tpu.memory_space<vmem>>, vector<1x128xf32>
    tpu.vector_store %arg5[%84, %c0_31], %83 {strides = array<i32>} : memref<8x128xf32, #tpu.memory_space<vmem>>, vector<1x128xf32>,
    %c5_i32 = arith.constant 5 : i32
    %86 = arith.addi %0, %c5_i32 : i32
    %c0_32 = arith.constant 0 : index
    %87 = arith.index_cast %86 : i32 to index
    %88 = memref.load %arg1[%c0_32, %87] : memref<3x16xi32, #tpu.memory_space<smem>>
    %c1_33 = arith.constant 1 : index
    %89 = arith.index_cast %86 : i32 to index
    %90 = memref.load %arg1[%c1_33, %89] : memref<3x16xi32, #tpu.memory_space<smem>>
    %c2_34 = arith.constant 2 : index
    %91 = arith.index_cast %86 : i32 to index
    %92 = memref.load %arg1[%c2_34, %91] : memref<3x16xi32, #tpu.memory_space<smem>>
    %93 = arith.index_cast %88 : i32 to index
    %c0_35 = arith.constant 0 : index
    %94 = vector.load %arg2[%93, %c0_35] : memref<48x128xf32, #tpu.memory_space<vmem>>, vector<1x128xf32>
    %95 = arith.index_cast %90 : i32 to index
    %c0_36 = arith.constant 0 : index
    %96 = vector.load %arg2[%95, %c0_36] : memref<48x128xf32, #tpu.memory_space<vmem>>, vector<1x128xf32>
    %97 = arith.addf %94, %96 : vector<1x128xf32>
    %98 = arith.index_cast %92 : i32 to index
    %c0_37 = arith.constant 0 : index
    %99 = vector.load %arg2[%98, %c0_37] : memref<48x128xf32, #tpu.memory_space<vmem>>, vector<1x128xf32>
    %100 = arith.addf %97, %99 : vector<1x128xf32>
    %101 = arith.index_cast %c5_i32 : i32 to index
    %c0_38 = arith.constant 0 : index
    %102 = vector.load %arg5[%101, %c0_38] : memref<8x128xf32, #tpu.memory_space<vmem>>, vector<1x128xf32>
    tpu.vector_store %arg5[%101, %c0_38], %100 {strides = array<i32>} : memref<8x128xf32, #tpu.memory_space<vmem>>, vector<1x128xf32>,
    %c6_i32 = arith.constant 6 : i32
    %103 = arith.addi %0, %c6_i32 : i32
    %c0_39 = arith.constant 0 : index
    %104 = arith.index_cast %103 : i32 to index
    %105 = memref.load %arg1[%c0_39, %104] : memref<3x16xi32, #tpu.memory_space<smem>>
    %c1_40 = arith.constant 1 : index
    %106 = arith.index_cast %103 : i32 to index
    %107 = memref.load %arg1[%c1_40, %106] : memref<3x16xi32, #tpu.memory_space<smem>>
    %c2_41 = arith.constant 2 : index
    %108 = arith.index_cast %103 : i32 to index
    %109 = memref.load %arg1[%c2_41, %108] : memref<3x16xi32, #tpu.memory_space<smem>>
    %110 = arith.index_cast %105 : i32 to index
    %c0_42 = arith.constant 0 : index
    %111 = vector.load %arg2[%110, %c0_42] : memref<48x128xf32, #tpu.memory_space<vmem>>, vector<1x128xf32>
    %112 = arith.index_cast %107 : i32 to index
    %c0_43 = arith.constant 0 : index
    %113 = vector.load %arg2[%112, %c0_43] : memref<48x128xf32, #tpu.memory_space<vmem>>, vector<1x128xf32>
    %114 = arith.addf %111, %113 : vector<1x128xf32>
    %115 = arith.index_cast %109 : i32 to index
    %c0_44 = arith.constant 0 : index
    %116 = vector.load %arg2[%115, %c0_44] : memref<48x128xf32, #tpu.memory_space<vmem>>, vector<1x128xf32>
    %117 = arith.addf %114, %116 : vector<1x128xf32>
    %118 = arith.index_cast %c6_i32 : i32 to index
    %c0_45 = arith.constant 0 : index
    %119 = vector.load %arg5[%118, %c0_45] : memref<8x128xf32, #tpu.memory_space<vmem>>, vector<1x128xf32>
    tpu.vector_store %arg5[%118, %c0_45], %117 {strides = array<i32>} : memref<8x128xf32, #tpu.memory_space<vmem>>, vector<1x128xf32>,
    %c7_i32 = arith.constant 7 : i32
    %120 = arith.addi %0, %c7_i32 : i32
    %c0_46 = arith.constant 0 : index
    %121 = arith.index_cast %120 : i32 to index
    %122 = memref.load %arg1[%c0_46, %121] : memref<3x16xi32, #tpu.memory_space<smem>>
    %c1_47 = arith.constant 1 : index
    %123 = arith.index_cast %120 : i32 to index
    %124 = memref.load %arg1[%c1_47, %123] : memref<3x16xi32, #tpu.memory_space<smem>>
    %c2_48 = arith.constant 2 : index
    %125 = arith.index_cast %120 : i32 to index
    %126 = memref.load %arg1[%c2_48, %125] : memref<3x16xi32, #tpu.memory_space<smem>>
    %127 = arith.index_cast %122 : i32 to index
    %c0_49 = arith.constant 0 : index
    %128 = vector.load %arg2[%127, %c0_49] : memref<48x128xf32, #tpu.memory_space<vmem>>, vector<1x128xf32>
    %129 = arith.index_cast %124 : i32 to index
    %c0_50 = arith.constant 0 : index
    %130 = vector.load %arg2[%129, %c0_50] : memref<48x128xf32, #tpu.memory_space<vmem>>, vector<1x128xf32>
    %131 = arith.addf %128, %130 : vector<1x128xf32>
    %132 = arith.index_cast %126 : i32 to index
    %c0_51 = arith.constant 0 : index
    %133 = vector.load %arg2[%132, %c0_51] : memref<48x128xf32, #tpu.memory_space<vmem>>, vector<1x128xf32>
    %134 = arith.addf %131, %133 : vector<1x128xf32>
    %135 = arith.index_cast %c7_i32 : i32 to index
    %c0_52 = arith.constant 0 : index
    %136 = vector.load %arg5[%135, %c0_52] : memref<8x128xf32, #tpu.memory_space<vmem>>, vector<1x128xf32>
    tpu.vector_store %arg5[%135, %c0_52], %134 {strides = array<i32>} : memref<8x128xf32, #tpu.memory_space<vmem>>, vector<1x128xf32>,
    %c8_i32_53 = arith.constant 8 : i32
    %c0_54 = arith.constant 0 : index
    %c0_55 = arith.constant 0 : index
    %137 = vector.load %arg5[%c0_54, %c0_55] : memref<8x128xf32, #tpu.memory_space<vmem>>, vector<8x128xf32>
    %cst = arith.constant dense<0.000000e+00> : vector<8xf32>
    %138 = vector.multi_reduction <add>, %137, %cst [1] : vector<8x128xf32> to vector<8xf32>
    %139 = vector.shape_cast %138 : vector<8xf32> to vector<8x1xf32>
    %cst_56 = arith.constant 7.812500e-03 : f32
    %140 = vector.broadcast %cst_56 : f32 to vector<8x1xf32>
    %141 = arith.mulf %139, %140 : vector<8x1xf32>
    %142 = arith.mulf %137, %137 : vector<8x128xf32>
    %cst_57 = arith.constant dense<0.000000e+00> : vector<8xf32>
    %143 = vector.multi_reduction <add>, %142, %cst_57 [1] : vector<8x128xf32> to vector<8xf32>
    %144 = vector.shape_cast %143 : vector<8xf32> to vector<8x1xf32>
    %cst_58 = arith.constant 7.812500e-03 : f32
    %145 = vector.broadcast %cst_58 : f32 to vector<8x1xf32>
    %146 = arith.mulf %144, %145 : vector<8x1xf32>
    %147 = arith.mulf %141, %141 : vector<8x1xf32>
    %148 = arith.subf %146, %147 : vector<8x1xf32>
    %cst_59 = arith.constant 0.000000e+00 : f32
    %149 = vector.broadcast %cst_59 : f32 to vector<8x1xf32>
    %150 = arith.maximumf %148, %149 : vector<8x1xf32>
    %151 = vector.broadcast %141 : vector<8x1xf32> to vector<8x128xf32>
    %152 = arith.subf %137, %151 : vector<8x128xf32>
    %cst_60 = arith.constant 9.99999974E-6 : f32
    %153 = vector.broadcast %cst_60 : f32 to vector<8x1xf32>
    %154 = arith.addf %150, %153 : vector<8x1xf32>
    %155 = math.rsqrt %154 : vector<8x1xf32>
    %156 = vector.broadcast %155 : vector<8x1xf32> to vector<8x128xf32>
    %157 = arith.mulf %152, %156 : vector<8x128xf32>
    %c0_61 = arith.constant 0 : index
    %c0_62 = arith.constant 0 : index
    %158 = vector.load %arg3[%c0_61, %c0_62] : memref<1x128xf32, #tpu.memory_space<vmem>>, vector<1x128xf32>
    %159 = vector.broadcast %158 : vector<1x128xf32> to vector<8x128xf32>
    %160 = arith.mulf %157, %159 : vector<8x128xf32>
    %c0_63 = arith.constant 0 : index
    %c0_64 = arith.constant 0 : index
    %161 = vector.load %arg4[%c0_63, %c0_64] : memref<1x128xf32, #tpu.memory_space<vmem>>, vector<1x128xf32>
    %162 = vector.broadcast %161 : vector<1x128xf32> to vector<8x128xf32>
    %163 = arith.addf %160, %162 : vector<8x128xf32>
    %c0_65 = arith.constant 0 : index
    %c0_66 = arith.constant 0 : index
    %164 = vector.load %arg5[%c0_65, %c0_66] : memref<8x128xf32, #tpu.memory_space<vmem>>, vector<8x128xf32>
    tpu.vector_store %arg5[%c0_65, %c0_66], %163 {strides = array<i32>} : memref<8x128xf32, #tpu.memory_space<vmem>>, vector<8x128xf32>,
    return
  }
  func.func @transform_0(%arg0: i32, %arg1: memref<3x16xi32, #tpu.memory_space<smem>>) -> (i32, i32) {
    %c0_i32 = arith.constant 0 : i32
    %c0_i32_0 = arith.constant 0 : i32
    %c0_i32_1 = arith.constant 0 : i32
    return %c0_i32, %c0_i32_0 : i32, i32
  }
  func.func @transform_1(%arg0: i32, %arg1: memref<3x16xi32, #tpu.memory_space<smem>>) -> (i32, i32) {
    %c0_i32 = arith.constant 0 : i32
    %c0_i32_0 = arith.constant 0 : i32
    %c0_i32_1 = arith.constant 0 : i32
    return %c0_i32, %c0_i32_0 : i32, i32
  }
  func.func @transform_2(%arg0: i32, %arg1: memref<3x16xi32, #tpu.memory_space<smem>>) -> (i32, i32) {
    %c0_i32 = arith.constant 0 : i32
    %c0_i32_0 = arith.constant 0 : i32
    %c0_i32_1 = arith.constant 0 : i32
    return %c0_i32, %c0_i32_0 : i32, i32
  }
  func.func @transform_3(%arg0: i32, %arg1: memref<3x16xi32, #tpu.memory_space<smem>>) -> (i32, i32) {
    %c0_i32 = arith.constant 0 : i32
    %c0_i32_0 = arith.constant 0 : i32
    return %arg0, %c0_i32 : i32, i32
  }
}

</mosaic_0001>

<bundles_post_ra>
// kernel: tpu_custom_call.1
= control target key start
LH: loop header
LB: loop body
LE: loop exit
PB: predicated region body
PF: predicated region fallthrough
CT: control target
= control target key end

     0   :  { %s932_s0 = inlined_call_operand.hbm [shape: s32[3,16], index: 0, kind: input, shape index: {}]   ;;  %s933_s1 = inlined_call_operand.hbm [shape: f32[48,128], index: 1, kind: input, shape index: {}]   ;;  %s934_s2 = inlined_call_operand.vmem [shape: f32[1,128], index: 2, kind: input, shape index: {}]   ;;  %s935_s3 = inlined_call_operand.vmem [shape: f32[1,128], index: 3, kind: input, shape index: {}]   ;;  %s936_s4 = inlined_call_operand.hbm [shape: f32[16,128], index: 4, kind: output, shape index: {}]  }
   0x1   :  { %944 = sst [smem:[#allocation14_spill]] %s933_s1  ;;  %s598_s17 = scalar_lea.hbm %s932_s0, 64 }
   0x2   :  { %p599_p0 = scmp.ne.s32.totalorder %s932_s0, %s598_s17  ;;  %p602_p1 = scmp.lt.u32.totalorder %s598_s17, %s932_s0 }
   0x4   :  { %p604_p2 = pnand %p602_p1, %p599_p0 }
   0x6   :  { %607 = shalt.err (!%p604_p2)  }
   0x7   :  { %s706_s22 = smov [#allocation3]  }
   0x8   :  { %10 = dma.hbm_to_smem %s932_s0, 64, %s706_s22, [#allocation2] }
   0x9   :  { %680 = dma.done.wait [#allocation2], 64 }
   0xa   :  { %681 = vsyncadd [#allocation2], 4294967232 }
   0xb   :  { %12 = sfence }
   0xc   :  { %13 = vsyncpa [#allocation5], 0 }
   0xd   :  { %14 = vsyncpa [#allocation6], 0 }
   0xe   :  { %16 = vsyncpa [#allocation6 + $0x1], 0  ;;  %s748_s25 = smov 0   ;;  %s750_s26 = smov 0  }
   0xf   :  { %s752_s27 = smov 0   ;;  %s754_s28 = smov 0  }
  0x10 LB: > { %945 = sst [smem:[#allocation11_spill]] %s700_s27  ;;  %s769_s0 = sadd.s32 4294967295, %s704_s28   ;;  %s704_s28 = sphi %s754_s28, %s959_s28   ;;  %s700_s27 = sphi %s752_s27, %s961_s27   ;;  %s696_s26 = sphi %s750_s26, %s963_s26   ;;  %s692_s25 = sphi %s748_s25, %s962_s25  }
  0x11   : > { %s482_s29 = sadd.s32 4294967294, %s704_s28   ;;  %s773_s30 = sadd.s32 1, %s704_s28  }
  0x12   : > { %946 = sst [smem:[#allocation12_spill]] %s773_s30  ;;  %s92_s5 = sadd.s32 1, %s700_s27 }
  0x13   : > { %s89_s6 = ssub.s32 %s704_s28, %s773_s30  ;;  %p102_p3 = scmp.ne.s32.totalorder %s700_s27, %s696_s26 }
  0x14   : > { %p90_p4 = scmp.eq.s32.totalorder %s89_s6, 0  ;;  %p103_p5 = scmp.eq.s32.totalorder %s769_s0, 1 }
  0x15   : > { %p108_p6 = scmp.ne.s32.totalorder %s696_s26, %s692_s25  ;;  %p109_p7 = scmp.eq.s32.totalorder %s482_s29, 1 }
  0x16   : > { %s784_s7 = scalar_select %p90_p4, %s700_s27, %s92_s5  }
  0x17   : > { %p786_p8 = por %p103_p5, %p102_p3  ;;  %p790_p9 = por %p109_p7, %p108_p6 }
  0x18   : > { %947 = sst [smem:[#allocation13_spill]] %s784_s7  ;;  %p483_p10 = scmp.ge.s32.totalorder %s704_s28, 1 }
  0x19   : > { %s948_s8 = scalar_select %p786_p8, 1, 0 }
  0x1a   : > { %s949_s9 = scalar_select %p790_p9, 1, 0 }
  0x1b   : > { %p116_p11 = scmp.lt.s32.totalorder %s704_s28, 3  ;;  %p937_p12 = scmp.eq.s32.totalorder %s769_s0, 0 }
  0x1c   : > { %s707_s11 = smov [#allocation4]   ;;  %s952_s1 = sld [smem:[#allocation14_spill]] }
  0x1d   : > { %p797_p13 = pnand %p483_p10, %p116_p11  ;;  %s128_s12 = sshll.u32 %s707_s11, 4  ;;  %s129_s12 = int_to_ptr.vmem [resolvable:$true] %s128_s12 }
  0x1f   : > { %s950_s10 = scalar_select %p797_p13, 1, 0 }
  0x20   : > { %p549_p0 = pneg %p797_p13 }
  0x22   : > { %p805_p1 = pnand %p937_p12, %p549_p0  ;;  %s608_s16 = scalar_lea.hbm %s952_s1, 768 }
  0x23   : > { %p609_p2 = scmp.ne.s32.totalorder %s952_s1, %s608_s16  ;;  %p615_p6 = scmp.lt.u32.totalorder %s608_s16, %s952_s1 }
  0x24   : > { %p610_p3 = pneg %p805_p1 }
  0x26   : > { %p611_p4 = pnand %p610_p3, %p609_p2 }
  0x28   : > { %p612_p5 = pneg %p611_p4 }
  0x2a   : > { %p617_p7 = pnand %p615_p6, %p612_p5 }
  0x2c   : > { %620 = shalt.err (!%p617_p7)
}
  0x2d   : > { %s621_s21 = scalar_lea.vmem %s129_s12, 768  ;;  %p629_p12 = scmp.lt.s32.totalorder %s129_s12, %s129_s12 }
  0x2e   : > { %p622_p10 = scmp.ne.s32.totalorder %s129_s12, %s621_s21  ;;  %p630_p9 = scmp.lt.s32.totalorder %s621_s21, %s621_s21 }
  0x30   : > { %p624_p11 = pnand %p622_p10, %p610_p3  ;;  %p631_p8 = por %p630_p9, %p629_p12 }
  0x32   : > { %p625_p0 = pneg %p624_p11 }
  0x34   : > { %p632_p13 = pnand %p631_p8, %p625_p0 }
  0x36   : > { %635 = shalt.err (!%p632_p13)
}
  0x37   : > { %s708_s22 = smov 128   ;;  %s709_s23 = smov 8  }
  0x38   : > { %552 = dma.hbm_to_vmem [thread:$0]  (!%p805_p1), %s952_s1, 768, %s129_s12, [#allocation5], %s708_s22, %s708_s22, %s709_s23  }
  0x39   : > { %p953_p2 = scmp.ne.s32.totalorder %s950_s10, 0 }
  0x3a   : > { %p954_p4 = scmp.eq.s32.totalorder (!%p953_p2), %s769_s0, 0 }
  0x3b   : > { %150 = sbr.rel (%p953_p2) target bundleno = 326 (0x146), region = 32 }
  0x42   : > { %683 = dma.done.wait (%p954_p4), [#allocation5], 768   ;;  %p955_p3 = pmov %p954_p4 }
  0x43   : > { %s940_s5 = sand.u32 1, %s696_s26   ;;  %s833_s6 = sshll.u32 %s769_s0, 3  ;;  %v505_v52 = vld [vmem:[%s934_s2] ss:$0 sm:$0xff] }
  0x44   : > { %685 = vsyncadd (%p955_p3), [#allocation5], 4294966528  ;;  %s837_s11 = sshll.u32 %s940_s5, 3  ;;  %s170_s10 = sld [smem:[#allocation3 + %s833_s6]]  ;;  %v506_v54 = vld [vmem:[%s935_s3] ss:$0 sm:$0xff] }
  0x45   : > { %s171_s12 = sshra.s32 %s833_s6, 7  ;;  %s176_s14 = sand.u32 127, %s833_s6 }
  0x46   : > { %s511_s13 = sshll.u32 %s171_s12, 7  ;;  %s192_s21 = sadd.s32 1, %s833_s6 }
  0x47   : > { %s512_s15 = sadd.s32 128, %s511_s13  ;;  %s514_s16 = sadd.s32 256, %s511_s13 }
  0x48   : > { %s177_s17 = sadd.s32 %s512_s15, %s176_s14  ;;  %s181_s18 = sadd.s32 %s514_s16, %s176_s14 }
  0x49   : > { %s178_s19 = sld [smem:[#allocation3 + %s177_s17]]  ;;  %s194_s23 = sshra.s32 %s192_s21, 7 }
  0x4a   : > { %s182_s20 = sld [smem:[#allocation3 + %s181_s18]]  ;;  %s515_s24 = sshll.u32 %s194_s23, 7 }
  0x4b   : > { %s193_s22 = sld [smem:[#allocation3 + %s192_s21]]  ;;  %s199_s29 = sand.u32 127, %s192_s21 }
  0x4c   : > { %s516_s1 = sadd.s32 128, %s515_s24  ;;  %s518_s7 = sadd.s32 256, %s515_s24 }
  0x4d   : > { %s183_s5 = scalar_lea.vmem [#allocation4], %s170_s10  ;;  %s200_s27 = sadd.s32 %s516_s1, %s199_s29 }
  0x4e   : > { %v184_v0 = vld [vmem:[%s183_s5] sm:$0x1]  ;;  %s204_s30 = sadd.s32 %s518_s7, %s199_s29  ;;  %s201_s14 = sld [smem:[#allocation3 + %s200_s27]] }
  0x4f   : > { %s185_s12 = scalar_lea.vmem [#allocation4], %s178_s19  ;;  %s205_s15 = sld [smem:[#allocation3 + %s204_s30]] }
  0x50   : > { %v186_v1 = vld [vmem:[%s185_s12] sm:$0x1]  ;;  %s188_s13 = scalar_lea.vmem [#allocation4], %s182_s20  ;;  %s215_s16 = sadd.s32 2, %s833_s6 }
  0x51   : > { %v189_v2 = vld [vmem:[%s188_s13] sm:$0x1]  ;;  %v187_v3 = vadd.f32 %v186_v1, %v184_v0  ;;  %s844_s17 = sld [smem:[#allocation3 + %s215_s16]]  ;;  %s217_s18 = sshra.s32 %s215_s16, 7 }
  0x52   : > { %s519_s21 = sshll.u32 %s217_s18, 7  ;;  %s222_s23 = sand.u32 127, %s215_s16 }
  0x53   : > { %v190_v4 = vadd.f32 %v189_v2, %v187_v3  ;;  %s520_s10 = sadd.s32 128, %s519_s21  ;;  %s522_s5 = sadd.s32 256, %s519_s21 }
  0x54   : > { %s847_s1 = scalar_lea.vmem [#allocation7], %s837_s11  ;;  %s206_s7 = scalar_lea.vmem [#allocation4], %s193_s22 }
  0x55   : > { %191 = vst [vmem:[%s847_s1] sm:$0x1] %v190_v4  ;;  %v207_v5 = vld [vmem:[%s206_s7] sm:$0x1]  ;;  %s223_s19 = sadd.s32 %s520_s10, %s222_s23  ;;  %s227_s27 = sadd.s32 %s522_s5, %s222_s23 }
  0x56   : > { %s208_s30 = scalar_lea.vmem [#allocation4], %s201_s14  ;;  %s211_s20 = scalar_lea.vmem [#allocation4], %s205_s15 }
  0x57   : > { %v209_v6 = vld [vmem:[%s208_s30] sm:$0x1]  ;;  %s224_s24 = sld [smem:[#allocation3 + %s223_s19]]  ;;  %s238_s12 = sadd.s32 3, %s833_s6 }
  0x58   : > { %v212_v7 = vld [vmem:[%s211_s20] sm:$0x1]  ;;  %s228_s29 = sld [smem:[#allocation3 + %s227_s27]]  ;;  %v210_v8 = vadd.f32 %v209_v6, %v207_v5  ;;  %s240_s11 = sshra.s32 %s238_s12, 7 }
  0x59   : > { %s851_s13 = sld [smem:[#allocation3 + %s238_s12]]  ;;  %s523_s16 = sshll.u32 %s240_s11, 7 }
  0x5a   : > { %v213_v9 = vadd.f32 %v212_v7, %v210_v8  ;;  %s245_s22 = sand.u32 127, %s238_s12  ;;  %s524_s18 = sadd.s32 128, %s523_s16 }
  0x5b   : > { %s526_s21 = sadd.s32 256, %s523_s16  ;;  %s229_s23 = scalar_lea.vmem [#allocation4], %s844_s17 }
  0x5c   : > { %214 = vst [vmem:[%s847_s1 + $0x1] sm:$0x1] %v213_v9  ;;  %v230_v10 = vld [vmem:[%s229_s23] sm:$0x1]  ;;  %s246_s14 = sadd.s32 %s524_s18, %s245_s22  ;;  %s250_s10 = sadd.s32 %s526_s21, %s245_s22 }
  0x5d   : > { %s231_s15 = scalar_lea.vmem [#allocation4], %s224_s24  ;;  %s247_s7 = sld [smem:[#allocation3 + %s246_s14]] }
  0x5e   : > { %v232_v11 = vld [vmem:[%s231_s15] sm:$0x1]  ;;  %s234_s5 = scalar_lea.vmem [#allocation4], %s228_s29  ;;  %s251_s19 = sld [smem:[#allocation3 + %s250_s10]] }
  0x5f   : > { %v235_v12 = vld [vmem:[%s234_s5] sm:$0x1]  ;;  %v233_v13 = vadd.f32 %v232_v11, %v230_v10  ;;  %s261_s27 = sadd.s32 4, %s833_s6  ;;  %s252_s22 = scalar_lea.vmem [#allocation4], %s851_s13 }
  0x60   : > { %s856_s30 = sld [smem:[#allocation3 + %s261_s27]]  ;;  %s263_s20 = sshra.s32 %s261_s27, 7  ;;  %v253_v15 = vld [vmem:[%s252_s22] sm:$0x1] }
  0x61   : > { %v236_v14 = vadd.f32 %v235_v12, %v233_v13  ;;  %s527_s12 = sshll.u32 %s263_s20, 7  ;;  %s268_s17 = sand.u32 127, %s261_s27 }
  0x62   : > { %s528_s11 = sadd.s32 128, %s527_s12  ;;  %s530_s16 = sadd.s32 256, %s527_s12 }
  0x63   : > { %237 = vst [vmem:[%s847_s1 + $0x2] sm:$0x1] %v236_v14  ;;  %s269_s24 = sadd.s32 %s528_s11, %s268_s17  ;;  %s273_s18 = sadd.s32 %s530_s16, %s268_s17 }
  0x64   : > { %s254_s29 = scalar_lea.vmem [#allocation4], %s247_s7  ;;  %s257_s21 = scalar_lea.vmem [#allocation4], %s251_s19 }
  0x65   : > { %v255_v16 = vld [vmem:[%s254_s29] sm:$0x1]  ;;  %s270_s23 = sld [smem:[#allocation3 + %s269_s24]]  ;;  %s284_s10 = sadd.s32 5, %s833_s6 }
  0x66   : > { %v258_v17 = vld [vmem:[%s257_s21] sm:$0x1]  ;;  %s274_s14 = sld [smem:[#allocation3 + %s273_s18]]  ;;  %v256_v18 = vadd.f32 %v255_v16, %v253_v15  ;;  %s286_s5 = sshra.s32 %s284_s10, 7 }
  0x67   : > { %s861_s15 = sld [smem:[#allocation3 + %s284_s10]]  ;;  %s531_s27 = sshll.u32 %s286_s5, 7 }
  0x68   : > { %v259_v19 = vadd.f32 %v258_v17, %v256_v18  ;;  %s291_s13 = sand.u32 127, %s284_s10  ;;  %s532_s20 = sadd.s32 128, %s531_s27 }
  0x69   : > { %s534_s12 = sadd.s32 256, %s531_s27  ;;  %s275_s17 = scalar_lea.vmem [#allocation4], %s856_s30 }
  0x6a   : > { %260 = vst [vmem:[%s847_s1 + $0x3] sm:$0x1] %v259_v19  ;;  %v276_v20 = vld [vmem:[%s275_s17] sm:$0x1]  ;;  %s292_s7 = sadd.s32 %s532_s20, %s291_s13  ;;  %s296_s11 = sadd.s32 %s534_s12, %s291_s13 }
  0x6b   : > { %s277_s19 = scalar_lea.vmem [#allocation4], %s270_s23  ;;  %s293_s22 = sld [smem:[#allocation3 + %s292_s7]] }
  0x6c   : > { %v278_v21 = vld [vmem:[%s277_s19] sm:$0x1]  ;;  %s280_s16 = scalar_lea.vmem [#allocation4], %s274_s14  ;;  %s297_s24 = sld [smem:[#allocation3 + %s296_s11]] }
  0x6d   : > { %v281_v22 = vld [vmem:[%s280_s16] sm:$0x1]  ;;  %v279_v23 = vadd.f32 %v278_v21, %v276_v20  ;;  %s307_s18 = sadd.s32 6, %s833_s6  ;;  %s298_s13 = scalar_lea.vmem [#allocation4], %s861_s15 }
  0x6e   : > { %s866_s29 = sld [smem:[#allocation3 + %s307_s18]]  ;;  %s309_s21 = sshra.s32 %s307_s18, 7  ;;  %v299_v25 = vld [vmem:[%s298_s13] sm:$0x1] }
  0x6f   : > { %v282_v24 = vadd.f32 %v281_v22, %v279_v23  ;;  %s535_s10 = sshll.u32 %s309_s21, 7  ;;  %s314_s30 = sand.u32 127, %s307_s18 }
  0x70   : > { %s536_s5 = sadd.s32 128, %s535_s10  ;;  %s538_s27 = sadd.s32 256, %s535_s10 }
  0x71   : > { %283 = vst [vmem:[%s847_s1 + $0x4] sm:$0x1] %v282_v24  ;;  %s315_s23 = sadd.s32 %s536_s5, %s314_s30  ;;  %s319_s20 = sadd.s32 %s538_s27, %s314_s30 }
  0x72   : > { %s300_s14 = scalar_lea.vmem [#allocation4], %s293_s22  ;;  %s303_s12 = scalar_lea.vmem [#allocation4], %s297_s24 }
  0x73   : > { %v301_v26 = vld [vmem:[%s300_s14] sm:$0x1]  ;;  %s316_s17 = sld [smem:[#allocation3 + %s315_s23]]  ;;  %s330_s11 = sadd.s32 7, %s833_s6 }
  0x74   : > { %v304_v27 = vld [vmem:[%s303_s12] sm:$0x1]  ;;  %s320_s7 = sld [smem:[#allocation3 + %s319_s20]]  ;;  %v302_v28 = vadd.f32 %v301_v26, %v299_v25  ;;  %s332_s16 = sshra.s32 %s330_s11, 7 }
  0x75   : > { %s331_s19 = sld [smem:[#allocation3 + %s330_s11]]  ;;  %s539_s18 = sshll.u32 %s332_s16, 7 }
  0x76   : > { %v305_v29 = vadd.f32 %v304_v27, %v302_v28  ;;  %s337_s21 = sand.u32 127, %s330_s11  ;;  %s540_s15 = sadd.s32 128, %s539_s18 }
  0x77   : > { %s542_s10 = sadd.s32 256, %s539_s18  ;;  %s321_s30 = scalar_lea.vmem [#allocation4], %s866_s29 }
  0x78   : > { %306 = vst [vmem:[%s847_s1 + $0x5] sm:$0x1] %v305_v29  ;;  %v322_v30 = vld [vmem:[%s321_s30] sm:$0x1]  ;;  %s338_s22 = sadd.s32 %s540_s15, %s337_s21  ;;  %s342_s5 = sadd.s32 %s542_s10, %s337_s21 }
  0x79   : > { %s323_s27 = scalar_lea.vmem [#allocation4], %s316_s17  ;;  %s339_s6 = sld [smem:[#allocation3 + %s338_s22]] }
  0x7a   : > { %v324_v31 = vld [vmem:[%s323_s27] sm:$0x1]  ;;  %s326_s24 = scalar_lea.vmem [#allocation4], %s320_s7  ;;  %s343_s13 = sld [smem:[#allocation3 + %s342_s5]] }
  0x7b   : > { %v327_v32 = vld [vmem:[%s326_s24] sm:$0x1]  ;;  %v325_v33 = vadd.f32 %v324_v31, %v322_v30  ;;  %s344_s23 = scalar_lea.vmem [#allocation4], %s331_s19  ;;  %s508_s11 = sshll.u32 %s769_s0, 7 }
  0x7c   : > { %v345_v35 = vld [vmem:[%s344_s23] sm:$0x1]  ;;  %s399_s19 = sshll.u32 %s847_s1, 4  ;;  %s887_s21 = scalar_lea.hbm %s936_s4, %s508_s11  ;;  %s889_s19 = int_to_ptr.vmem [resolvable:$true] %s399_s19 }
  0x7d   : > { %v328_v34 = vadd.f32 %v327_v32, %v325_v33  ;;  %s956_s15 = sand.u32 1, %s696_s26   ;;  %s636_s30 = scalar_lea.vmem %s889_s19, 128 }
  0x7e   : > { %s386_s10 = scalar_lea.sflag [#allocation6], %s956_s15  ;;  %p637_p8 = scmp.ne.s32.totalorder %s889_s19, %s636_s30 }
  0x7f   : > { %329 = vst [vmem:[%s847_s1 + $0x6] sm:$0x1] %v328_v34  ;;  %s346_s20 = scalar_lea.vmem [#allocation4], %s339_s6  ;;  %p957_p9 = scmp.ne.s32.totalorder %s948_s8, 0 }
  0x80   : > { %v347_v36 = vld [vmem:[%s346_s20] sm:$0x1]  ;;  %s349_s14 = scalar_lea.vmem [#allocation4], %s343_s13  ;;  %s710_s0 = smov [#allocation7]  }
  0x81   : > { %v350_v37 = vld [vmem:[%s349_s14] sm:$0x1]  ;;  %v348_v38 = vadd.f32 %v347_v36, %v345_v35  ;;  %p638_p12 = pnand %p637_p8, %p957_p9  ;;  %s640_s22 = sshll.u32 %s710_s0, 4  ;;  %s641_s22 = int_to_ptr.vmem [resolvable:$false] %s640_s22 }
  0x82   : > { %s642_s5 = scalar_lea.vmem %s641_s22, 256  ;;  %p643_p1 = scmp.lt.s32.totalorder %s889_s19, %s641_s22 }
  0x83   : > { %v351_v39 = vadd.f32 %v350_v37, %v348_v38  ;;  %p639_p13 = pneg %p638_p12  ;;  %p644_p5 = scmp.lt.s32.totalorder %s642_s5, %s636_s30 }
  0x85   : > { %352 = vst [vmem:[%s847_s1 + $0x7] sm:$0x1] %v351_v39  ;;  %p645_p6 = por %p644_p5, %p643_p1 }
  0x87   : > { %p646_p7 = pnand %p645_p6, %p639_p13 }
  0x8c   : > { %v353_v40 = vld [vmem:[%s847_s1] sm:$0xff] }
  0x8d   : > { %354 = vadd.xlane.f32.xlu0 %v353_v40  ;;  %v357_v41 = vmul.f32 %v353_v40, %v353_v40 }
  0x91   : > { %358 = vadd.xlane.f32.xlu0 %v357_v41 }
 0x11a   : > { %v355_v42 = vpop.xlane.xlu0 %354 }
 0x11b   : > { %v356_v43 = vmul.f32 0.0078125, %v355_v42 }
 0x11d   : > { %v361_v45 = vmul.f32 %v356_v43, %v356_v43  ;;  %v364_v50 = vsub.f32 %v353_v40, %v356_v43 }
 0x11e   : > { %v359_v44 = vpop.xlane.xlu0 %358 }
 0x11f   : > { %v360_v46 = vmul.f32 0.0078125, %v359_v44 }
 0x121   : > { %v362_v47 = vsub.f32 %v360_v46, %v361_v45 }
 0x123   : > { %v363_v48 = vmax.f32 %v362_v47, 0.0 }
 0x125   : > { %v365_v49 = vadd.f32 1e-05, %v363_v48 }
 0x127   : > { %596 = vrsqrt.f32 %v365_v49 }
 0x131   : > { %v597_v51 = vpop.eup %596 }
 0x132   : > { %v367_v53 = vmul.f32 %v597_v51, %v364_v50 }
 0x134   : > { %v375_v55 = vmul.f32 %v505_v52, %v367_v53 }
 0x136   : > { %v383_v56 = vadd.f32 %v506_v54, %v375_v55 }
 0x138   : > { %384 = vst [vmem:[%s847_s1] sm:$0xff] %v383_v56 }
 0x139   : > { %649 = shalt.err (!%p646_p7)
}
 0x13a   : > { %s650_s1 = scalar_lea.hbm %s887_s21, 128  ;;  %s654_s6 = scalar_lea.hbm %s936_s4, 256 }
 0x13b   : > { %p651_p10 = scmp.ne.s32.totalorder %s887_s21, %s650_s1  ;;  %p655_p2 = scmp.lt.u32.totalorder %s887_s21, %s936_s4 }
 0x13c   : > { %p656_p4 = scmp.lt.u32.totalorder %s654_s6, %s650_s1  ;;  %p658_p8 = scmp.lt.u32.totalorder %s650_s1, %s887_s21 }
 0x13d   : > { %p652_p11 = pnand %p651_p10, %p957_p9 }
 0x13e   : > { %p657_p3 = por %p656_p4, %p655_p2 }
 0x13f   : > { %p653_p0 = pneg %p652_p11 }
 0x140   : > { %p659_p12 = por %p658_p8, %p657_p3 }
 0x142   : > { %p660_p13 = pnand %p659_p12, %p653_p0 }
 0x144   : > { %663 = shalt.err (!%p660_p13)
}
 0x145   : > { %547 = dma.vmem_to_hbm [thread:$0]  (%p957_p9), %s889_s19, 128, %s887_s21, %s386_s10  }
 0x146 PF: > { %p559_p1 = scmp.ge.s32.totalorder %s704_s28, 2  ;;  %s411_s20 = sand.u32 1, %s692_s25  }
 0x147   : > { %p958_p5 = scmp.ne.s32.totalorder %s949_s9, 0  ;;  %s412_s14 = scalar_lea.sflag [#allocation6], %s411_s20 }
 0x149   : > { %p554_p6 = pnand %p559_p1, %p958_p5 }
 0x14b   : > { %687 = dma.done.wait (!%p554_p6), %s412_s14, 128  }
 0x14c   : > { %689 = vsyncadd (!%p554_p6), %s412_s14, 4294967168  ;;  %s959_s28 = sld [smem:[#allocation12_spill]]  ;;  %s960_s29 = sld [smem:[#allocation11_spill]] }
 0x14d   : > { %s961_s27 = sld [smem:[#allocation13_spill]]  ;;  %s962_s25 = smov %s696_s26 }
 0x152   : > { %p19_p7 = scmp.ge.s32.totalorder %s959_s28, 4   ;;  %s963_s26 = smov %s960_s29 }
 0x154   :  { %21 = sbr.rel (!%p19_p7) target bundleno = 16 (0x10), region = 93 }
 0x15b   :  { %417 = vsyncpa [#allocation5], 1 }
 0x15c   :  { %419 = vsyncpa [#allocation5 + $0x1], 1 }
 0x15d   :  { %420 = vsyncpa [#allocation6], 1 }
 0x15e   :  { %422 = vsyncpa [#allocation6 + $0x1], 1 }

</bundles_post_ra>
